<compile_context>
chip_gen: v7x
topology: tpu7x:2x2x1
jax: 0.10.0
libtpu: 0.0.40
codegen_flags: <defaults>
</compile_context>

<pallas_src>
import jax
import jax.numpy as jnp
from jax import lax
from jax.experimental import pallas as pl
from jax.experimental.pallas import tpu as pltpu

IN_FEATURES = 28 * 28   # 784
OUT_FEATURES = 10
OUT_PAD = 16            # class axis padded to a full bf16 sublane tile


def _round_up(n, m):
    return ((n + m - 1) // m) * m


def logits_kernel(x_ref, w_ref, b_ref, o_ref):
    # x_ref: [TILE_B, 784] bf16   w_ref: [16, 784] bf16
    # b_ref: [16, 1] f32          o_ref: [16, TILE_B] f32
    #
    # Transposed linear: z = W @ x^T  -> [16, TILE_B], f32 accumulation on MXU.
    z = lax.dot_general(
        w_ref[...], x_ref[...],
        dimension_numbers=(((1,), (1,)), ((), ())),
        preferred_element_type=jnp.float32)
    z = z + b_ref[...]                                    # bias broadcast over lanes

    # Numerically stable sigmoid; reciprocal on the EUP.
    ez = jnp.exp(-jnp.abs(z))                             # in (0, 1]
    inv = pl.reciprocal(1.0 + ez, approx=True)
    s = jnp.where(z >= 0.0, inv, ez * inv)                # sigmoid(z)

    # Softmax over the class axis (sublanes).  s in (0,1) -> exp(s) <= e, so no
    # max-subtraction needed.  Mask the padded class rows out of the sum.
    e = jnp.exp(s)
    row = lax.broadcasted_iota(jnp.int32, e.shape, 0)
    e = jnp.where(row < OUT_FEATURES, e, 0.0)
    denom = jnp.sum(e, axis=0, keepdims=True)             # [1, TILE_B], >= 10
    o_ref[...] = (e / denom).astype(o_ref.dtype)          # exact normalization


def logits_forward(x, weight, bias, *, tile_b=2048):
    """x: [B, 784] f32, weight: [10, 784] f32 (PyTorch layout), bias: [10] f32."""
    B = x.shape[0]

    # bf16 streaming of the big operands; accumulation stays f32 in-kernel.
    x_bf = x.astype(jnp.bfloat16)
    w_pad = jnp.pad(weight.astype(jnp.bfloat16),
                    ((0, OUT_PAD - OUT_FEATURES), (0, 0)))          # [16, 784] bf16
    b_pad = jnp.pad(bias, (0, OUT_PAD - OUT_FEATURES)
                    ).reshape(OUT_PAD, 1).astype(jnp.float32)       # [16, 1] f32

    # Tile selection: multiple of 128 (lane dim of the transposed output tile,
    # also satisfies bf16 sublane packing of the x tile).  Cap at ~B/2 so v7x
    # megacore gets >=2 grid steps to shard whenever B is large enough.
    tile_b = _round_up(max(int(tile_b), 128), 128)
    half = _round_up(pl.cdiv(B, 2), 128)
    tile_b = min(tile_b, max(half, 128))
    B_pad = _round_up(B, tile_b)
    if B_pad != B:
        x_bf = jnp.pad(x_bf, ((0, B_pad - B), (0, 0)))
    grid_b = B_pad // tile_b

    # Double-buffered footprint (x tiles dominate) + slack; set explicitly so
    # larger tile_b overrides don't trip the scoped-VMEM default.
    vmem_need = (2 * tile_b * IN_FEATURES * 2            # x bf16, double-buffered
                 + 2 * OUT_PAD * tile_b * 4              # out f32, double-buffered
                 + 2 * OUT_PAD * _round_up(IN_FEATURES, 128) * 2   # resident W
                 + (4 << 20))                            # bias + compiler slack
    vmem_limit = max(16 << 20, vmem_need)

    cost = pl.CostEstimate(
        flops=2 * B_pad * IN_FEATURES * OUT_PAD,
        transcendentals=2 * B_pad * OUT_PAD,
        bytes_accessed=(2 * B_pad * IN_FEATURES          # read x (bf16)
                        + 4 * OUT_PAD * B_pad            # write out (f32)
                        + 2 * OUT_PAD * IN_FEATURES      # read W (bf16)
                        + 4 * OUT_PAD),                  # read bias
    )

    out_t = pl.pallas_call(
        logits_kernel,
        out_shape=jax.ShapeDtypeStruct((OUT_PAD, B_pad), jnp.float32),
        grid=(grid_b,),
        in_specs=[
            # x: one batch tile per grid step (double-buffered by Pallas).
            pl.BlockSpec((tile_b, IN_FEATURES), lambda i: (i, 0)),
            # weight / bias: constant index_map -> VMEM-resident across tiles.
            pl.BlockSpec((OUT_PAD, IN_FEATURES), lambda i: (0, 0)),
            pl.BlockSpec((OUT_PAD, 1), lambda i: (0, 0)),
        ],
        # Transposed output tile: classes on sublanes, batch on lanes
        # (full-lane, unmasked stores).
        out_specs=pl.BlockSpec((OUT_PAD, tile_b), lambda i: (0, i)),
        compiler_params=pltpu.CompilerParams(
            dimension_semantics=("parallel",),   # shard batch tiles on v7x megacore
            vmem_limit_bytes=vmem_limit,
        ),
        cost_estimate=cost,
    )(x_bf, w_pad, b_pad)

    # Tiny glue: drop class padding / batch padding, restore [B, 10] layout.
    return out_t[:OUT_FEATURES, :B].T


if __name__ == "__main__":
    key = jax.random.PRNGKey(0)
    k_x, k_w, k_b, k_x2 = jax.random.split(key, 4)

    # Deterministic "parameters" (synthetic init, matching nn.Linear shapes).
    bound = 1.0 / (IN_FEATURES ** 0.5)
    weight = jax.random.uniform(
        k_w, (OUT_FEATURES, IN_FEATURES), jnp.float32, minval=-bound, maxval=bound)
    bias = jax.random.uniform(
        k_b, (OUT_FEATURES,), jnp.float32, minval=-bound, maxval=bound)

    def ref_fn(xx):
        return jax.nn.softmax(jax.nn.sigmoid(xx @ weight.T + bias), axis=1)

    # Case 1: small batch (single 128-row tile after padding).
    B = 8
    x = jax.random.normal(k_x, (B, IN_FEATURES), jnp.float32)
    out = jax.block_until_ready(logits_forward(x, weight, bias))
    assert out.shape == (B, OUT_FEATURES)
    assert bool(jnp.all(jnp.abs(jnp.sum(out, axis=1) - 1.0) < 1e-3))
    assert bool(jnp.max(jnp.abs(out - ref_fn(x))) < 5e-3)

    # Case 2: batch not divisible by the tile -> multi-step grid + padding path.
    B2 = 300
    x2 = jax.random.normal(k_x2, (B2, IN_FEATURES), jnp.float32)
    out2 = jax.block_until_ready(logits_forward(x2, weight, bias, tile_b=128))
    assert out2.shape == (B2, OUT_FEATURES)
    assert bool(jnp.all(jnp.abs(jnp.sum(out2, axis=1) - 1.0) < 1e-3))
    assert bool(jnp.max(jnp.abs(out2 - ref_fn(x2))) < 5e-3)

    print("KERNEL_OK")
</pallas_src>

<mosaic_0001>
module attributes {stable_mosaic.version = 11 : i64} {
  func.func @logits_kernel(%arg0: i32, %arg1: memref<128x784xbf16, #tpu.memory_space<vmem>>, %arg2: memref<16x784xbf16, #tpu.memory_space<vmem>>, %arg3: memref<16x1xf32, #tpu.memory_space<vmem>>, %arg4: memref<16x128xf32, #tpu.memory_space<vmem>>) attributes {dimension_semantics = [#tpu.dimension_semantics<parallel>], iteration_bounds = array<i64: 1>, scalar_prefetch = 0 : i64, scratch_operands = 0 : i64, tpu.core_type = #tpu.core_type<tc>, window_params = [{transform_indices = @transform_0, window_bounds = array<i64: 128, 784>}, {pipeline_mode = #tpu.pipeline_mode<synchronous>, transform_indices = @transform_1, window_bounds = array<i64: 16, 784>}, {pipeline_mode = #tpu.pipeline_mode<synchronous>, transform_indices = @transform_2, window_bounds = array<i64: 16, 1>}, {transform_indices = @transform_3, window_bounds = array<i64: 16, 128>}]} {
    %c0 = arith.constant 0 : index
    %c0_0 = arith.constant 0 : index
    %0 = vector.load %arg2[%c0, %c0_0] : memref<16x784xbf16, #tpu.memory_space<vmem>>, vector<16x784xbf16>
    %c0_1 = arith.constant 0 : index
    %c0_2 = arith.constant 0 : index
    %1 = vector.load %arg1[%c0_1, %c0_2] : memref<128x784xbf16, #tpu.memory_space<vmem>>, vector<128x784xbf16>
    %cst = arith.constant dense<0.000000e+00> : vector<16x128xf32>
    %2 = tpu.matmul %0, %1, %cst {dimension_numbers = #tpu.dot_dimension_numbers<[1], [1], [0], [0], [0, 0, 1, 0], [], []>} : vector<16x784xbf16>, vector<128x784xbf16>, vector<16x128xf32> -> vector<16x128xf32>
    %c0_3 = arith.constant 0 : index
    %c0_4 = arith.constant 0 : index
    %3 = vector.load %arg3[%c0_3, %c0_4] : memref<16x1xf32, #tpu.memory_space<vmem>>, vector<16x1xf32>
    %4 = vector.broadcast %3 : vector<16x1xf32> to vector<16x128xf32>
    %5 = arith.addf %2, %4 : vector<16x128xf32>
    %6 = math.absf %5 : vector<16x128xf32>
    %cst_5 = arith.constant 0.000000e+00 : f32
    %7 = vector.broadcast %cst_5 : f32 to vector<16x128xf32>
    %8 = arith.subf %7, %6 : vector<16x128xf32>
    %9 = math.exp %8 : vector<16x128xf32>
    %cst_6 = arith.constant 1.000000e+00 : f32
    %10 = vector.broadcast %cst_6 : f32 to vector<16x128xf32>
    %11 = arith.addf %10, %9 : vector<16x128xf32>
    %12 = tpu.reciprocal %11 {approx = true} : vector<16x128xf32> -> vector<16x128xf32>
    %cst_7 = arith.constant 0.000000e+00 : f32
    %13 = vector.broadcast %cst_7 : f32 to vector<16x128xf32>
    %14 = arith.cmpf oge, %5, %13 : vector<16x128xf32>
    %15 = arith.mulf %9, %12 : vector<16x128xf32>
    %16 = arith.select %14, %12, %15 : vector<16x128xi1>, vector<16x128xf32>
    %17 = math.exp %16 : vector<16x128xf32>
    %18 = tpu.iota {dimensions = array<i32: 0>} : vector<16x128xi32>
    %c10_i32 = arith.constant 10 : i32
    %19 = vector.broadcast %c10_i32 : i32 to vector<16x128xi32>
    %20 = arith.cmpi slt, %18, %19 : vector<16x128xi32>
    %cst_8 = arith.constant 0.000000e+00 : f32
    %21 = vector.broadcast %cst_8 : f32 to vector<16x128xf32>
    %22 = arith.select %20, %17, %21 : vector<16x128xi1>, vector<16x128xf32>
    %cst_9 = arith.constant dense<0.000000e+00> : vector<128xf32>
    %23 = vector.multi_reduction <add>, %22, %cst_9 [0] : vector<16x128xf32> to vector<128xf32>
    %24 = vector.shape_cast %23 : vector<128xf32> to vector<1x128xf32>
    %25 = vector.broadcast %24 : vector<1x128xf32> to vector<16x128xf32>
    %26 = arith.divf %22, %25 : vector<16x128xf32>
    %c0_10 = arith.constant 0 : index
    %c0_11 = arith.constant 0 : index
    %27 = vector.load %arg4[%c0_10, %c0_11] : memref<16x128xf32, #tpu.memory_space<vmem>>, vector<16x128xf32>
    tpu.vector_store %arg4[%c0_10, %c0_11], %26 {strides = array<i32>} : memref<16x128xf32, #tpu.memory_space<vmem>>, vector<16x128xf32>,
    return
  }
  func.func @transform_0(%arg0: i32) -> (i32, i32) {
    %c0_i32 = arith.constant 0 : i32
    %c0_i32_0 = arith.constant 0 : i32
    return %arg0, %c0_i32 : i32, i32
  }
  func.func @transform_1(%arg0: i32) -> (i32, i32) {
    %c0_i32 = arith.constant 0 : i32
    %c0_i32_0 = arith.constant 0 : i32
    %c0_i32_1 = arith.constant 0 : i32
    return %c0_i32, %c0_i32_0 : i32, i32
  }
  func.func @transform_2(%arg0: i32) -> (i32, i32) {
    %c0_i32 = arith.constant 0 : i32
    %c0_i32_0 = arith.constant 0 : i32
    %c0_i32_1 = arith.constant 0 : i32
    return %c0_i32, %c0_i32_0 : i32, i32
  }
  func.func @transform_3(%arg0: i32) -> (i32, i32) {
    %c0_i32 = arith.constant 0 : i32
    %c0_i32_0 = arith.constant 0 : i32
    return %c0_i32, %arg0 : i32, i32
  }
}

</mosaic_0001>

<bundles_post_ra>
// kernel: tpu_custom_call.1
= control target key start
LH: loop header
LB: loop body
LE: loop exit
PB: predicated region body
PF: predicated region fallthrough
CT: control target
= control target key end

     0   :  { %v904_v6 = vmov 0   ;;  %s1155_s0 = inlined_call_operand.vmem [shape: bf16[128,784], index: 0, kind: input, shape index: {}]   ;;  %s1156_s1 = inlined_call_operand.vmem [shape: bf16[16,784], index: 1, kind: input, shape index: {}]   ;;  %s1157_s2 = inlined_call_operand.vmem [shape: f32[16,1], index: 2, kind: input, shape index: {}]   ;;  %s1158_s3 = inlined_call_operand.hbm [shape: f32[16,128], index: 3, kind: output, shape index: {}]  }
   0x1   :  { %v776_v0 = vld [vmem:[%s1155_s0 + $0x4] ss:$28 sps:$4 sm:$0xff]   ;;  %v778_v1 = vld [vmem:[%s1155_s0 + $0x14] ss:$28 sps:$4 sm:$0xff]   ;;  %v782_v4 = vld [vmem:[%s1155_s0 + $0x3c] ss:$28 sps:$4 sm:$0xff]   ;;  %775 = vset.pattern.permute.xlu0 %v904_v6 }
   0x2   :  { %443 = vmatprep.subr.bf16.mxu1 %v776_v0  ;;  %v780_v2 = vld [vmem:[%s1155_s0] ss:$28 sps:$4 sm:$0xff]   ;;  %v781_v3 = vld [vmem:[%s1155_s0 + $0x10] ss:$28 sps:$4 sm:$0xff]   ;;  %525 = vmatprep.subr.bf16.mxu0 %v778_v1  ;;  %v786_v7 = vld [vmem:[%s1155_s0 + $0x38] ss:$28 sps:$4 sm:$0xff]  }
   0x3   :  { %444 = vmatpush1.bf16.xpose.msra.mxu1 %v780_v2  ;;  %526 = vmatpush1.bf16.xpose.msra.mxu0 %v781_v3  ;;  %v784_v5 = vld [vmem:[%s1155_s0 + $0x4c] ss:$28 sps:$4 sm:$0xff]   ;;  %v788_v9 = vld [vmem:[%s1155_s0 + $0x74] ss:$28 sps:$4 sm:$0xff]   ;;  %v790_v10 = vld [vmem:[%s1155_s0 + $0x84] ss:$28 sps:$4 sm:$0xff]  }
   0x4   :  { %445 = vmatprep.subr.bf16.mxu1 %v782_v4  ;;  %527 = vmatprep.subr.bf16.mxu0 %v784_v5  ;;  %v787_v8 = vld [vmem:[%s1155_s0 + $0x48] ss:$28 sps:$4 sm:$0xff]   ;;  %v792_v11 = vld [vmem:[%s1155_s0 + $0x70] ss:$28 sps:$4 sm:$0xff]   ;;  %v793_v12 = vld [vmem:[%s1155_s0 + $0x80] ss:$28 sps:$4 sm:$0xff]  }
   0x5   :  { %v794_v13 = vld [vmem:[%s1155_s0 + $0xac] ss:$28 sps:$4 sm:$0xff]   ;;  %v796_v14 = vld [vmem:[%s1155_s0 + $0xbc] ss:$28 sps:$4 sm:$0xff]   ;;  %v826_v16 = vld [vmem:[%s1156_s1 + $0x4] ss:$28 sps:$4 sm:$0xff]  }
   0x6   :  { %v798_v15 = vld [vmem:[%s1155_s0 + $0xa8] ss:$28 sps:$4 sm:$0xff]   ;;  %v799_v17 = vld [vmem:[%s1155_s0 + $0xb8] ss:$28 sps:$4 sm:$0xff]   ;;  %475 = vmatprep.mubr.bf16.mxu1 %v826_v16  ;;  %v804_v21 = vld [vmem:[%s1155_s0 + $0xe0] ss:$28 sps:$4 sm:$0xff]  }
   0x7   :  { %v800_v18 = vld [vmem:[%s1155_s0 + $0xe4] ss:$28 sps:$4 sm:$0xff]   ;;  %v802_v19 = vld [vmem:[%s1155_s0 + $0xf4] ss:$28 sps:$4 sm:$0xff]   ;;  %v806_v23 = vld [vmem:[%s1155_s0 + $0x11c] ss:$28 sps:$4 sm:$0xff]  }
   0x8   :  { %v832_v20 = vld [vmem:[%s1156_s1 + $0x14] ss:$28 sps:$4 sm:$0xff]   ;;  %v808_v24 = vld [vmem:[%s1155_s0 + $0x12c] ss:$28 sps:$4 sm:$0xff]   ;;  %v814_v28 = vld [vmem:[%s1155_s0 + $0x164] ss:$28 sps:$4 sm:$0xff]  }
   0x9   :  { %557 = vmatprep.mubr.bf16.mxu0 %v832_v20  ;;  %v805_v22 = vld [vmem:[%s1155_s0 + $0xf0] ss:$28 sps:$4 sm:$0xff]   ;;  %v810_v25 = vld [vmem:[%s1155_s0 + $0x118] ss:$28 sps:$4 sm:$0xff]   ;;  %v811_v26 = vld [vmem:[%s1155_s0 + $0x128] ss:$28 sps:$4 sm:$0xff]  }
   0xa   :  { %v812_v27 = vld [vmem:[%s1155_s0 + $0x154] ss:$28 sps:$4 sm:$0xff]   ;;  %v89_v29 = vld [vmem:[%s1157_s2 + $0x8] sm:$0xff] }
   0xb   :  { %446 = vmatpush1.bf16.xpose.msra.mxu1 %v786_v7  ;;  %528 = vmatpush1.bf16.xpose.msra.mxu0 %v787_v8 }
   0xc   :  { %447 = vmatprep.subr.bf16.mxu1 %v788_v9  ;;  %529 = vmatprep.subr.bf16.mxu0 %v790_v10 }
  0x13   :  { %448 = vmatpush1.bf16.xpose.msra.mxu1 %v792_v11  ;;  %530 = vmatpush1.bf16.xpose.msra.mxu0 %v793_v12 }
  0x14   :  { %449 = vmatprep.subr.bf16.mxu1 %v794_v13  ;;  %531 = vmatprep.subr.bf16.mxu0 %v796_v14 }
  0x1b   :  { %450 = vmatpush1.bf16.xpose.msra.mxu1 %v798_v15  ;;  %532 = vmatpush1.bf16.xpose.msra.mxu0 %v799_v17 }
  0x1c   :  { %451 = vmatprep.subr.bf16.mxu1 %v800_v18  ;;  %533 = vmatprep.subr.bf16.mxu0 %v802_v19 }
  0x23   :  { %452 = vmatpush1.bf16.xpose.msra.mxu1 %v804_v21  ;;  %534 = vmatpush1.bf16.xpose.msra.mxu0 %v805_v22 }
  0x24   :  { %453 = vmatprep.subr.bf16.mxu1 %v806_v23  ;;  %535 = vmatprep.subr.bf16.mxu0 %v808_v24 }
  0x2b   :  { %454 = vmatpush1.bf16.xpose.msra.mxu1 %v810_v25  ;;  %536 = vmatpush1.bf16.xpose.msra.mxu0 %v811_v26 }
  0x2c   :  { %455 = vmatprep.subr.bf16.mxu1 %v812_v27  ;;  %537 = vmatprep.subr.bf16.mxu0 %v814_v28 }
  0x2d   :  { %8 = vsyncpa [#allocation3], 0  ;;  %97 = vperm.xlu0 %775, %v89_v29   ;;  %v88_v30 = vld [vmem:[%s1157_s2] sm:$0xff]  ;;  %v816_v31 = vld [vmem:[%s1155_s0 + $0x150] ss:$28 sps:$4 sm:$0xff]   ;;  %v905_v38 = vmov 0.0  }
  0x2e   :  { %v817_v32 = vld [vmem:[%s1155_s0 + $0x160] ss:$28 sps:$4 sm:$0xff]   ;;  %v818_v33 = vld [vmem:[%s1155_s0 + $0x18c] ss:$28 sps:$4 sm:$0xff]   ;;  %v823_v36 = vld [vmem:[%s1155_s0 + $0x198] ss:$28 sps:$4 sm:$0xff]  }
  0x2f   :  { %v820_v34 = vld [vmem:[%s1155_s0 + $0x19c] ss:$28 sps:$4 sm:$0xff]   ;;  %v822_v35 = vld [vmem:[%s1155_s0 + $0x188] ss:$28 sps:$4 sm:$0xff]   ;;  %vm415_vm0 = vcmask 130048   ;;  %vm906_vm1 = vmmov 0  }
  0x30   :  { %v829_v37 = vld [vmem:[%s1155_s0 + $0xc] ss:$28 sps:$4 sm:$0xff]   ;;  %v833_v39 = vld [vmem:[%s1155_s0 + $0x18] ss:$28 sps:$4 sm:$0xff]   ;;  %v824_v40 = vld [vmem:[%s1156_s1] ss:$28 sps:$4 sm:$0xff]  }
  0x31   :  { %92 = vperm.xlu0 %775, %v88_v30   ;;  %v830_v41 = vld [vmem:[%s1156_s1 + $0x10] ss:$28 sps:$4 sm:$0xff]   ;;  %v827_v42 = vld [vmem:[%s1155_s0 + $0x8] ss:$28 sps:$4 sm:$0xff]   ;;  %v420_v43 = vsel %vm415_vm0, %v833_v39, 0 }
  0x32   :  { %v836_v44 = vld [vmem:[%s1155_s0 + $0x44] ss:$28 sps:$4 sm:$0xff]   ;;  %v864_v45 = vld [vmem:[%s1156_s1 + $0xc] ss:$28 sps:$4 sm:$0xff]   ;;  %v840_v49 = vld [vmem:[%s1155_s0 + $0x7c] ss:$28 sps:$4 sm:$0xff]  }
  0x33   :  { %456 = vmatpush1.bf16.xpose.msra.mxu1 %v816_v31  ;;  %538 = vmatpush1.bf16.xpose.msra.mxu0 %v817_v32  ;;  %v837_v46 = vld [vmem:[%s1155_s0 + $0x50] ss:$28 sps:$4 sm:$0xff]   ;;  %v834_v47 = vld [vmem:[%s1155_s0 + $0x40] ss:$28 sps:$4 sm:$0xff]   ;;  %v841_v50 = vld [vmem:[%s1155_s0 + $0x88] ss:$28 sps:$4 sm:$0xff]  }
  0x34   :  { %457 = vmatprep.subr.bf16.mxu1 %v818_v33  ;;  %539 = vmatprep.subr.bf16.mxu0 %v820_v34  ;;  %v423_v48 = vsel %vm415_vm0, %v837_v46, 0  ;;  %v838_v51 = vld [vmem:[%s1155_s0 + $0x78] ss:$28 sps:$4 sm:$0xff]   ;;  %v426_v52 = vsel %vm415_vm0, %v841_v50, 0  ;;  %v845_v54 = vld [vmem:[%s1155_s0 + $0xc0] ss:$28 sps:$4 sm:$0xff]  }
  0x35   :  { %v844_v53 = vld [vmem:[%s1155_s0 + $0xb4] ss:$28 sps:$4 sm:$0xff]   ;;  %v429_v56 = vsel %vm415_vm0, %v845_v54, 0  ;;  %v848_v57 = vld [vmem:[%s1155_s0 + $0xec] ss:$28 sps:$4 sm:$0xff]  }
  0x36   :  { %v842_v55 = vld [vmem:[%s1155_s0 + $0xb0] ss:$28 sps:$4 sm:$0xff]   ;;  %v849_v58 = vld [vmem:[%s1155_s0 + $0xf8] ss:$28 sps:$4 sm:$0xff]   ;;  %v846_v59 = vld [vmem:[%s1155_s0 + $0xe8] ss:$28 sps:$4 sm:$0xff]  }
  0x37   :  { %v432_v60 = vsel %vm415_vm0, %v849_v58, 0  ;;  %v852_v61 = vld [vmem:[%s1155_s0 + $0x124] ss:$28 sps:$4 sm:$0xff]   ;;  %v853_v62 = vld [vmem:[%s1155_s0 + $0x130] ss:$28 sps:$4 sm:$0xff]  }
  0x38   :  { %v850_v63 = vld [vmem:[%s1155_s0 + $0x120] ss:$28 sps:$4 sm:$0xff]   ;;  %v435_v0 = vsel %vm415_vm0, %v853_v62, 0  ;;  %v857_v2 = vld [vmem:[%s1155_s0 + $0x168] ss:$28 sps:$4 sm:$0xff]  }
  0x39   :  { %v856_v1 = vld [vmem:[%s1155_s0 + $0x15c] ss:$28 sps:$4 sm:$0xff]   ;;  %v438_v4 = vsel %vm415_vm0, %v857_v2, 0  ;;  %v860_v5 = vld [vmem:[%s1155_s0 + $0x194] ss:$28 sps:$4 sm:$0xff]  }
  0x3a   :  { %v854_v3 = vld [vmem:[%s1155_s0 + $0x158] ss:$28 sps:$4 sm:$0xff]   ;;  %v861_v6 = vld [vmem:[%s1155_s0 + $0x1a0] ss:$28 sps:$4 sm:$0xff]   ;;  %v858_v7 = vld [vmem:[%s1155_s0 + $0x190] ss:$28 sps:$4 sm:$0xff]  }
  0x3b   :  { %458 = vmatpush1.bf16.xpose.msra.mxu1 %v822_v35  ;;  %540 = vmatpush1.bf16.xpose.msra.mxu0 %v823_v36  ;;  %v441_v8 = vsel %vm415_vm0, %v861_v6, 0  ;;  %v862_v9 = vld [vmem:[%s1156_s1 + $0x8] ss:$28 sps:$4 sm:$0xff]   ;;  %v865_v10 = vld [vmem:[%s1156_s1 + $0x18] ss:$28 sps:$4 sm:$0xff]   ;;  %s907_s0 = smov [#allocation2]  }
  0x3c   :  { %484 = vmatprep.subr.bf16.mxu1 %v829_v37  ;;  %737 = vmatprep.subr.bf16.mxu0 %v905_v38  ;;  %s653_s1 = sshll.u32 %s907_s0, 4  ;;  %s654_s1 = int_to_ptr.vmem [resolvable:$true] %s653_s1 }
  0x3d   :  { %s880_s4 = scalar_lea.vmem %s654_s1, 256  ;;  %p885_p1 = scmp.lt.s32.totalorder %s654_s1, %s654_s1 }
  0x3e   :  { %p881_p0 = scmp.ne.s32.totalorder %s654_s1, %s880_s4  ;;  %p886_p2 = scmp.lt.s32.totalorder %s880_s4, %s880_s4 }
  0x40   :  { %p887_p3 = por %p886_p2, %p885_p1 }
  0x42   :  { %476 = vmatmul.mubr.bf16.vlgmr.msra.gmra.mrb[0].mxu1 %v824_v40  ;;  %558 = vmatmul.mubr.bf16.vlgmr.msra.gmra.mrb[0].mxu0 %v830_v41  ;;  %v629_v40 = vlaneseq  ;;  %p888_p4 = pnand %p887_p3, %p881_p0 }
  0x43   :  { %485 = vmatpush1.bf16.xpose.msra.mxu1 %v827_v42  ;;  %738 = vmatpush3.bf16.xpose.msra.mxu0 %v420_v43 }
  0x44   :  { %486 = vmatprep.subr.bf16.mxu1 %v836_v44  ;;  %739 = vmatprep.subr.bf16.mxu0 %v905_v38  ;;  %v630_v44 = vshrl.u32 %v629_v40, 7 }
  0x45   :  { %516 = vmatprep.mubr.bf16.mxu1 %v864_v45  ;;  %753 = vmatprep.mubr.msk.bf16.mxu0 %vm906_vm1, %v905_v38 }
  0x46   :  { %v631_v45 = vadd.s32 8, %v630_v44 }
  0x48   :  { %vm633_vm4 = vcmp.lt.s32.totalorder %v631_v45, 10 }
  0x4b   :  { %487 = vmatpush1.bf16.xpose.msra.mxu1 %v834_v47  ;;  %740 = vmatpush3.bf16.xpose.msra.mxu0 %v423_v48 }
  0x4c   :  { %488 = vmatprep.subr.bf16.mxu1 %v840_v49  ;;  %741 = vmatprep.subr.bf16.mxu0 %v905_v38 }
  0x53   :  { %489 = vmatpush1.bf16.xpose.msra.mxu1 %v838_v51  ;;  %742 = vmatpush3.bf16.xpose.msra.mxu0 %v426_v52 }
  0x54   :  { %490 = vmatprep.subr.bf16.mxu1 %v844_v53  ;;  %743 = vmatprep.subr.bf16.mxu0 %v905_v38 }
  0x5b   :  { %491 = vmatpush1.bf16.xpose.msra.mxu1 %v842_v55  ;;  %744 = vmatpush3.bf16.xpose.msra.mxu0 %v429_v56 }
  0x5c   :  { %492 = vmatprep.subr.bf16.mxu1 %v848_v57  ;;  %745 = vmatprep.subr.bf16.mxu0 %v905_v38 }
  0x63   :  { %493 = vmatpush1.bf16.xpose.msra.mxu1 %v846_v59  ;;  %746 = vmatpush3.bf16.xpose.msra.mxu0 %v432_v60 }
  0x64   :  { %494 = vmatprep.subr.bf16.mxu1 %v852_v61  ;;  %747 = vmatprep.subr.bf16.mxu0 %v905_v38 }
  0x6b   :  { %495 = vmatpush1.bf16.xpose.msra.mxu1 %v850_v63  ;;  %748 = vmatpush3.bf16.xpose.msra.mxu0 %v435_v0 }
  0x6c   :  { %496 = vmatprep.subr.bf16.mxu1 %v856_v1  ;;  %749 = vmatprep.subr.bf16.mxu0 %v905_v38 }
  0x73   :  { %497 = vmatpush1.bf16.xpose.msra.mxu1 %v854_v3  ;;  %750 = vmatpush3.bf16.xpose.msra.mxu0 %v438_v4 }
  0x74   :  { %498 = vmatprep.subr.bf16.mxu1 %v860_v5  ;;  %751 = vmatprep.subr.bf16.mxu0 %v905_v38 }
  0x7b   :  { %499 = vmatpush1.bf16.xpose.msra.mxu1 %v858_v7  ;;  %752 = vmatpush3.bf16.xpose.msra.mxu0 %v441_v8 }
  0x82   :  { %517 = vmatmul.mubr.bf16.vlgmr.msra.gmra.mrb[0].mxu1 %v862_v9  ;;  %754 = vmatmul.mubr.msk.bf16.vlgmr.msra.gmra.mrb[0].mxu0 %vm415_vm0, %v865_v10 }
  0xac   :  { %v98_v11 = vpop.permute.xlu0 %97 }
  0xb0   :  { %v93_v12 = vpop.permute.xlu0 %92 }
 0x155   :  { %v518_v13 = vpop.f32.mrb[0].mxu1  ;;  %v600_v14 = vpop.f32.mrb[0].mxu0 }
 0x156   :  { %v757_v15 = vadd.f32 %v518_v13, %v93_v12  ;;  %v520_v16 = vpop.f32.mrb[1].mxu1  ;;  %v755_v17 = vpop.f32.mrb[1].mxu0 }
 0x157   :  { %v521_v18 = vpop.f32.mrb[2].mxu1  ;;  %v603_v19 = vpop.f32.mrb[2].mxu0 }
 0x158   :  { %v758_v20 = vadd.f32 %v757_v15, %v600_v14  ;;  %v759_v21 = vadd.f32 %v521_v18, %v98_v11  ;;  %v523_v22 = vpop.f32.mrb[3].mxu1  ;;  %v756_v23 = vpop.f32.mrb[3].mxu0 }
 0x15a   :  { %v607_v24 = vand.u32 2147483647, %v758_v20  ;;  %v760_v25 = vadd.f32 %v759_v21, %v603_v19  ;;  %vm619_vm2 = vcmp.ge.f32.partialorder %v758_v20, 0.0 }
 0x15c   :  { %v609_v26 = vsub.f32 0.0, %v607_v24  ;;  %v608_v27 = vand.u32 2147483647, %v760_v25  ;;  %vm620_vm3 = vcmp.ge.f32.partialorder %v760_v25, 0.0 }
 0x15e   :  { %v611_v28 = vmul.f32 1.442695, %v609_v26  ;;  %v610_v29 = vsub.f32 0.0, %v608_v27 }
 0x160   :  { %866 = vpow2.f32 %v611_v28  ;;  %v613_v30 = vmul.f32 1.442695, %v610_v29 }
 0x162   :  { %868 = vpow2.f32 %v613_v30 }
 0x16a   :  { %v867_v31 = vpop.eup %866 }
 0x16b   :  { %v615_v32 = vadd.f32 1.0, %v867_v31 }
 0x16c   :  { %v869_v33 = vpop.eup %868 }
 0x16d   :  { %870 = vrcp.f32 %v615_v32  ;;  %v616_v34 = vadd.f32 1.0, %v869_v33 }
 0x16f   :  { %872 = vrcp.f32 %v616_v34 }
 0x177   :  { %v871_v35 = vpop.eup %870 }
 0x178   :  { %v621_v36 = vmul.f32 %v871_v35, %v867_v31 }
 0x179   :  { %v873_v37 = vpop.eup %872 }
 0x17a   :  { %v623_v38 = vsel %vm619_vm2, %v871_v35, %v621_v36  ;;  %v622_v39 = vmul.f32 %v873_v37, %v869_v33 }
 0x17b   :  { %v625_v41 = vmul.f32 1.442695, %v623_v38 }
 0x17c   :  { %v624_v42 = vsel %vm620_vm3, %v873_v37, %v622_v39 }
 0x17d   :  { %v627_v43 = vmul.f32 1.442695, %v624_v42 }
 0x17f   :  { %874 = vpow2.f32 %v627_v43 }
 0x180   :  { %876 = vpow2.f32 %v625_v41 }
 0x189   :  { %v875_v46 = vpop.eup %874 }
 0x18a   :  { %v877_v47 = vpop.eup %876  ;;  %v635_v48 = vsel %vm633_vm4, %v875_v46, 0.0 }
 0x18b   :  { %v636_v49 = vadd.f32 %v877_v47, %v635_v48 }
 0x18d   :  { %v637_v50 = vrot.slane %v636_v49, 4 }
 0x18f   :  { %v638_v51 = vadd.f32 %v637_v50, %v636_v49 }
 0x191   :  { %v639_v52 = vrot.slane %v638_v51, 2 }
 0x193   :  { %v640_v53 = vadd.f32 %v639_v52, %v638_v51 }
 0x195   :  { %v641_v54 = vrot.slane %v640_v53, 1 }
 0x197   :  { %v642_v55 = vadd.f32 %v641_v54, %v640_v53 }
 0x199   :  { %878 = vrcp.f32 %v642_v55 }
 0x1a3   :  { %v879_v56 = vpop.eup %878 }
 0x1a4   :  { %v644_v57 = vmul.f32 %v879_v56, %v877_v47  ;;  %v645_v58 = vmul.f32 %v879_v56, %v635_v48 }
 0x1a6   :  { %646 = vst [vmem:[#allocation2] sm:$0xff] %v644_v57  ;;  %647 = vst [vmem:[#allocation2 + $0x8] sm:$0xff] %v645_v58 }
 0x1a7   :  { %891 = shalt.err (!%p888_p4)
}
 0x1a8   :  { %s892_s7 = scalar_lea.hbm %s1158_s3, 256 }
 0x1a9   :  { %p893_p5 = scmp.ne.s32.totalorder %s1158_s3, %s892_s7  ;;  %p896_p6 = scmp.lt.u32.totalorder %s892_s7, %s1158_s3 }
 0x1ab   :  { %p898_p7 = pnand %p896_p6, %p893_p5 }
 0x1ad   :  { %901 = shalt.err (!%p898_p7)
}
 0x1ae   :  { %s908_s12 = smov 128   ;;  %s909_s13 = smov 8  }
 0x1af   :  { %659 = dma.vmem_to_hbm [thread:$0]  %s654_s1, 256, %s1158_s3, [#allocation3], %s908_s12, %s908_s12, %s909_s13  }
 0x1b0   :  { %902 = dma.done.wait [#allocation3], 256  }
 0x1b1   :  { %903 = vsyncadd [#allocation3], 4294967040 }
 0x1b2   :  { %663 = vsyncpa [#allocation3], 1 }

</bundles_post_ra>
